<compile_context>
chip_gen: v6e
topology: v6e:2x2x1
jax: 0.10.0
libtpu: 0.0.40
codegen_flags: <defaults>
</compile_context>

<pallas_src>
import functools

import jax
import jax.numpy as jnp
from jax import lax
from jax.experimental import pallas as pl
from jax.experimental.pallas import tpu as pltpu

NEG_SLOPE = 0.01        # nn.LeakyReLU() default negative_slope
SUB_ROWS = 256          # rows per in-kernel sub-chunk (bounds the vreg working set)
TM_MAX_DEFAULT = 8192   # row-tile cap; ~20 MiB VMEM at these widths (fits v7x 64 MiB)


def _round_up(x, m):
    return ((x + m - 1) // m) * m


def _choose_row_tiling(rows, tm_max):
    """Pick (tm, padded_rows): tm a multiple of 8 (and of SUB_ROWS when large),
    padded_rows % tm == 0, and an even number of grid steps whenever rows >= 16
    so the 'parallel' grid axis can feed both v7x TensorCores."""
    tm_max = max(SUB_ROWS, _round_up(tm_max, SUB_ROWS))
    if rows < 16:
        tm = 8
        return tm, _round_up(max(rows, 1), tm)
    half = _round_up((rows + 1) // 2, 8)
    if half <= SUB_ROWS:
        tm = half
    else:
        tm = min(_round_up(half, SUB_ROWS), tm_max)
    return tm, _round_up(rows, 2 * tm)


def _vmem_limit_bytes(tm, d_in, hidden_dims):
    """VMEM budget: double-buffered x/out row tiles (lane-padded to 128, f32),
    the VMEM-resident weights/biases, plus a fixed scratch margin.  Floored at
    the 32 MiB default scoped limit.  ~20 MiB at tm=8192 for these widths, so
    it is safe on v5e/v6e (128 MiB) and v7x (64 MiB per TensorCore)."""
    lane_bytes = lambda d: _round_up(d, 128) * 4
    tiles = 2 * tm * lane_bytes(d_in) + 2 * tm * lane_bytes(hidden_dims[-1])
    w_bytes = 0
    c = d_in
    for h in hidden_dims:
        w_bytes += _round_up(c, 8) * lane_bytes(h) + 8 * lane_bytes(h)
        c = h
    w_bytes *= 2  # pipeline still allocates two buffers for the resident blocks
    margin = 4 * 1024 * 1024
    return max(tiles + w_bytes + margin, 32 * 1024 * 1024)


def make_fused_encoder_kernel(num_layers, sub_rows, matmul_dtype):
    """Fused kernel: y = LeakyReLU(...LeakyReLU(x @ W1 + b1)... @ Wn + bn).

    Ref order: x_ref, (w1, b1, ..., wn, bn), o_ref.  The layer loop is unrolled
    at trace time; the row tile is processed in sub_rows-row sub-chunks so the
    intermediates stay in vregs and never round-trip through HBM (or spill)."""

    def kernel(x_ref, *refs):
        o_ref = refs[-1]
        # Constant index_maps keep weights/biases VMEM-resident; load + cast
        # once per grid step, hoisted out of the sub-chunk loop.
        ws = [refs[2 * l][...].astype(matmul_dtype) for l in range(num_layers)]
        bs = [refs[2 * l + 1][...] for l in range(num_layers)]

        n_sub = x_ref.shape[0] // sub_rows

        def chunk(r0):
            h = x_ref[pl.ds(r0, sub_rows), :]
            for w, b in zip(ws, bs):
                # bf16 (or f32) operands, f32 MXU accumulation.
                h = jnp.dot(h.astype(matmul_dtype), w,
                            preferred_element_type=jnp.float32) + b
                h = jnp.maximum(h, NEG_SLOPE * h)  # LeakyReLU: mul + max on VPU
            o_ref[pl.ds(r0, sub_rows), :] = h.astype(o_ref.dtype)

        if n_sub == 1:
            chunk(0)
        else:
            def body(s, carry):
                chunk(pl.multiple_of(s * sub_rows, sub_rows))
                return carry
            lax.fori_loop(0, n_sub, body, 0)

    return kernel


def fused_encoder(x2d, params, *, tm, matmul_dtype, out_dtype):
    """One pallas_call over row tiles; all layer weights resident in VMEM."""
    n_rows, d_in = x2d.shape
    d_out = params[-1][0].shape[1]
    num_layers = len(params)
    sub_rows = min(SUB_ROWS, tm)
    assert n_rows % tm == 0 and tm % sub_rows == 0

    in_specs = [pl.BlockSpec((tm, d_in), lambda i: (i, 0))]  # row tile of x
    args = [x2d]
    for w, b in params:
        di, do = w.shape
        # Constant index_map -> weight/bias blocks stay resident across the grid.
        in_specs.append(pl.BlockSpec((di, do), lambda i: (0, 0)))
        in_specs.append(pl.BlockSpec((1, do), lambda i: (0, 0)))
        args.append(w)
        args.append(b.reshape(1, do))

    hidden_dims = [w.shape[1] for w, _ in params]
    vmem_limit = _vmem_limit_bytes(tm, d_in, hidden_dims)

    return pl.pallas_call(
        make_fused_encoder_kernel(num_layers, sub_rows, matmul_dtype),
        out_shape=jax.ShapeDtypeStruct((n_rows, d_out), out_dtype),
        grid_spec=pltpu.PrefetchScalarGridSpec(
            num_scalar_prefetch=0,
            grid=(n_rows // tm,),
            in_specs=in_specs,
            out_specs=pl.BlockSpec((tm, d_out), lambda i: (i, 0)),
        ),
        compiler_params=pltpu.CompilerParams(
            dimension_semantics=("parallel",),   # shard row tiles across TCs (v7x)
            vmem_limit_bytes=vmem_limit,         # computed from tile sizes
        ),
    )(*args)


def init_rna_encoder_params(key, in_channels, hidden_dims):
    """Deterministic params mimicking PyTorch Linear init (uniform +/- 1/sqrt(fan_in))."""
    params = []
    c_in = in_channels
    for h in hidden_dims:
        key, kw, kb = jax.random.split(key, 3)
        bound = 1.0 / jnp.sqrt(jnp.float32(c_in))
        w = jax.random.uniform(kw, (c_in, h), jnp.float32, -bound, bound)
        b = jax.random.uniform(kb, (h,), jnp.float32, -bound, bound)
        params.append((w, b))
        c_in = h
    return params


@functools.partial(jax.jit, static_argnames=("tm_max", "matmul_dtype", "out_dtype"))
def rna_encoder_forward(x, params, *, tm_max=TM_MAX_DEFAULT,
                        matmul_dtype=jnp.bfloat16, out_dtype=None):
    """Forward pass of RNAEncoder: fused stacked (Linear -> LeakyReLU) layers."""
    lead_shape = x.shape[:-1]
    h = x.reshape(-1, x.shape[-1])            # (rows, in_channels)
    rows = h.shape[0]
    out_dtype = x.dtype if out_dtype is None else out_dtype

    tm, padded_rows = _choose_row_tiling(rows, tm_max)
    if padded_rows != rows:
        h = jnp.pad(h, ((0, padded_rows - rows), (0, 0)))

    out = fused_encoder(h, params, tm=tm, matmul_dtype=matmul_dtype,
                        out_dtype=out_dtype)
    out = out[:rows]
    return out.reshape(*lead_shape, out.shape[-1])


def reference_forward(x, params):
    h = x
    for w, b in params:
        h = jnp.dot(h, w, precision=lax.Precision.HIGHEST) + b
        h = jnp.where(h > 0, h, NEG_SLOPE * h)
    return h


if __name__ == "__main__":
    key = jax.random.PRNGKey(0)
    k1, k2, k3, kp = jax.random.split(key, 4)

    in_channels = 32
    hidden_dims = [64, 128]
    params = init_rna_encoder_params(kp, in_channels, hidden_dims)

    # Case 1: tiny (2, 8, 32).  Exact-f32 matmul path first (validates the fused
    # structure bit-tight vs the pure-JAX reference), then the bf16-MXU default.
    x1 = jax.random.normal(k1, (2, 8, in_channels), jnp.float32)
    ref1 = reference_forward(x1, params)
    out1_f32 = jax.block_until_ready(
        rna_encoder_forward(x1, params, matmul_dtype=jnp.float32))
    assert out1_f32.shape == (2, 8, hidden_dims[-1]), out1_f32.shape
    assert jnp.allclose(out1_f32, ref1, atol=1e-5, rtol=1e-5), "f32 path mismatch"
    out1 = jax.block_until_ready(rna_encoder_forward(x1, params))
    assert jnp.allclose(out1, ref1, atol=3e-2, rtol=3e-2), "bf16 path mismatch"

    # Case 2: rows not a tile multiple (3*70 = 210) -> padding + even 2-step grid.
    x2 = jax.random.normal(k2, (3, 70, in_channels), jnp.float32)
    out2 = jax.block_until_ready(rna_encoder_forward(x2, params))
    ref2 = reference_forward(x2, params)
    assert out2.shape == (3, 70, hidden_dims[-1]), out2.shape
    assert jnp.allclose(out2, ref2, atol=3e-2, rtol=3e-2), "mismatch (case 2)"

    # Case 3: 4*300 = 1200 rows -> tm rounded to a SUB_ROWS multiple (768),
    # exercising the in-kernel sub-chunk fori_loop and the even-grid padding.
    x3 = jax.random.normal(k3, (4, 300, in_channels), jnp.float32)
    out3 = jax.block_until_ready(rna_encoder_forward(x3, params))
    ref3 = reference_forward(x3, params)
    assert out3.shape == (4, 300, hidden_dims[-1]), out3.shape
    assert jnp.allclose(out3, ref3, atol=3e-2, rtol=3e-2), "mismatch (case 3)"

    # Optional bf16 output path (halves the dominant HBM write stream).
    out1_bf16 = jax.block_until_ready(
        rna_encoder_forward(x1, params, out_dtype=jnp.bfloat16))
    assert out1_bf16.dtype == jnp.bfloat16
    assert jnp.allclose(out1_bf16.astype(jnp.float32), ref1, atol=6e-2, rtol=6e-2)

    print("KERNEL_OK")
</pallas_src>

<mosaic_0001>
module attributes {stable_mosaic.version = 11 : i64} {
  func.func @kernel(%arg0: i32, %arg1: memref<8x32xf32, #tpu.memory_space<vmem>>, %arg2: memref<32x64xf32, #tpu.memory_space<vmem>>, %arg3: memref<1x64xf32, #tpu.memory_space<vmem>>, %arg4: memref<64x128xf32, #tpu.memory_space<vmem>>, %arg5: memref<1x128xf32, #tpu.memory_space<vmem>>, %arg6: memref<8x128xf32, #tpu.memory_space<vmem>>) attributes {dimension_semantics = [#tpu.dimension_semantics<parallel>], iteration_bounds = array<i64: 2>, scalar_prefetch = 0 : i64, scratch_operands = 0 : i64, tpu.core_type = #tpu.core_type<tc>, window_params = [{transform_indices = @transform_0, window_bounds = array<i64: 8, 32>}, {pipeline_mode = #tpu.pipeline_mode<synchronous>, transform_indices = @transform_1, window_bounds = array<i64: 32, 64>}, {pipeline_mode = #tpu.pipeline_mode<synchronous>, transform_indices = @transform_2, window_bounds = array<i64: 1, 64>}, {pipeline_mode = #tpu.pipeline_mode<synchronous>, transform_indices = @transform_3, window_bounds = array<i64: 64, 128>}, {pipeline_mode = #tpu.pipeline_mode<synchronous>, transform_indices = @transform_4, window_bounds = array<i64: 1, 128>}, {transform_indices = @transform_5, window_bounds = array<i64: 8, 128>}]} {
    %c0 = arith.constant 0 : index
    %c0_0 = arith.constant 0 : index
    %0 = vector.load %arg2[%c0, %c0_0] : memref<32x64xf32, #tpu.memory_space<vmem>>, vector<32x64xf32>
    %c0_1 = arith.constant 0 : index
    %c0_2 = arith.constant 0 : index
    %1 = vector.load %arg4[%c0_1, %c0_2] : memref<64x128xf32, #tpu.memory_space<vmem>>, vector<64x128xf32>
    %c0_3 = arith.constant 0 : index
    %c0_4 = arith.constant 0 : index
    %2 = vector.load %arg3[%c0_3, %c0_4] : memref<1x64xf32, #tpu.memory_space<vmem>>, vector<1x64xf32>
    %c0_5 = arith.constant 0 : index
    %c0_6 = arith.constant 0 : index
    %3 = vector.load %arg5[%c0_5, %c0_6] : memref<1x128xf32, #tpu.memory_space<vmem>>, vector<1x128xf32>
    %c0_7 = arith.constant 0 : index
    %c0_8 = arith.constant 0 : index
    %4 = vector.load %arg1[%c0_7, %c0_8] : memref<8x32xf32, #tpu.memory_space<vmem>>, vector<8x32xf32>
    %cst = arith.constant dense<0.000000e+00> : vector<8x64xf32>
    %5 = tpu.matmul %4, %0, %cst {dimension_numbers = #tpu.dot_dimension_numbers<[1], [0], [0], [1], [0, 0, 1, 1], [], []>} : vector<8x32xf32>, vector<32x64xf32>, vector<8x64xf32> -> vector<8x64xf32>
    %6 = vector.broadcast %2 : vector<1x64xf32> to vector<8x64xf32>
    %7 = arith.addf %5, %6 : vector<8x64xf32>
    %cst_9 = arith.constant 0.00999999977 : f32
    %8 = vector.broadcast %cst_9 : f32 to vector<8x64xf32>
    %9 = arith.mulf %8, %7 : vector<8x64xf32>
    %10 = arith.maximumf %7, %9 : vector<8x64xf32>
    %cst_10 = arith.constant dense<0.000000e+00> : vector<8x128xf32>
    %11 = tpu.matmul %10, %1, %cst_10 {dimension_numbers = #tpu.dot_dimension_numbers<[1], [0], [0], [1], [0, 0, 1, 1], [], []>} : vector<8x64xf32>, vector<64x128xf32>, vector<8x128xf32> -> vector<8x128xf32>
    %12 = vector.broadcast %3 : vector<1x128xf32> to vector<8x128xf32>
    %13 = arith.addf %11, %12 : vector<8x128xf32>
    %cst_11 = arith.constant 0.00999999977 : f32
    %14 = vector.broadcast %cst_11 : f32 to vector<8x128xf32>
    %15 = arith.mulf %14, %13 : vector<8x128xf32>
    %16 = arith.maximumf %13, %15 : vector<8x128xf32>
    %c0_12 = arith.constant 0 : index
    %c0_13 = arith.constant 0 : index
    %17 = vector.load %arg6[%c0_12, %c0_13] : memref<8x128xf32, #tpu.memory_space<vmem>>, vector<8x128xf32>
    tpu.vector_store %arg6[%c0_12, %c0_13], %16 {strides = array<i32>} : memref<8x128xf32, #tpu.memory_space<vmem>>, vector<8x128xf32>,
    return
  }
  func.func @transform_0(%arg0: i32) -> (i32, i32) {
    %c0_i32 = arith.constant 0 : i32
    %c0_i32_0 = arith.constant 0 : i32
    return %arg0, %c0_i32 : i32, i32
  }
  func.func @transform_1(%arg0: i32) -> (i32, i32) {
    %c0_i32 = arith.constant 0 : i32
    %c0_i32_0 = arith.constant 0 : i32
    %c0_i32_1 = arith.constant 0 : i32
    return %c0_i32, %c0_i32_0 : i32, i32
  }
  func.func @transform_2(%arg0: i32) -> (i32, i32) {
    %c0_i32 = arith.constant 0 : i32
    %c0_i32_0 = arith.constant 0 : i32
    %c0_i32_1 = arith.constant 0 : i32
    return %c0_i32, %c0_i32_0 : i32, i32
  }
  func.func @transform_3(%arg0: i32) -> (i32, i32) {
    %c0_i32 = arith.constant 0 : i32
    %c0_i32_0 = arith.constant 0 : i32
    %c0_i32_1 = arith.constant 0 : i32
    return %c0_i32, %c0_i32_0 : i32, i32
  }
  func.func @transform_4(%arg0: i32) -> (i32, i32) {
    %c0_i32 = arith.constant 0 : i32
    %c0_i32_0 = arith.constant 0 : i32
    %c0_i32_1 = arith.constant 0 : i32
    return %c0_i32, %c0_i32_0 : i32, i32
  }
  func.func @transform_5(%arg0: i32) -> (i32, i32) {
    %c0_i32 = arith.constant 0 : i32
    %c0_i32_0 = arith.constant 0 : i32
    return %arg0, %c0_i32 : i32, i32
  }
}

</mosaic_0001>

<bundles_post_ra>
// kernel: rna_encoder_forward.1
= control target key start
LH: loop header
LB: loop body
LE: loop exit
PB: predicated region body
PF: predicated region fallthrough
CT: control target
= control target key end

     0   :  { %10 = vsyncpa [#allocation3], 0  ;;  %s1050_s0 = inlined_call_operand.hbm [shape: f32[16,32], index: 0, kind: input, shape index: {}]   ;;  %s1051_s1 = inlined_call_operand.hbm [shape: f32[32,64], index: 1, kind: input, shape index: {}]   ;;  %s1052_s2 = inlined_call_operand.vmem [shape: f32[1,64], index: 2, kind: input, shape index: {}]   ;;  %s1053_s3 = inlined_call_operand.hbm [shape: f32[64,128], index: 3, kind: input, shape index: {}]   ;;  %s1054_s4 = inlined_call_operand.vmem [shape: f32[1,128], index: 4, kind: input, shape index: {}]   ;;  %s1055_s5 = inlined_call_operand.hbm [shape: f32[16,128], index: 5, kind: output, shape index: {}]  }
   0x1   :  { %12 = vsyncpa [#allocation3 + $0x1], 0 }
   0x2   :  { %13 = vsyncpa [#allocation6], 0 }
   0x3   :  { %14 = vsyncpa [#allocation4], 0 }
   0x4   :  { %16 = vsyncpa [#allocation4 + $0x1], 0  ;;  %s875_s18 = smov 0   ;;  %s877_s19 = smov 0  }
   0x5   :  { %s879_s20 = smov 0   ;;  %s881_s21 = smov 0  }
   0x6 LB: > { %s896_s22 = sadd.s32 4294967295, %s835_s21   ;;  %s552_s23 = sadd.s32 4294967294, %s835_s21   ;;  %s835_s21 = sphi %s881_s21, %s1077_s21   ;;  %s831_s20 = sphi %s879_s20, %s1076_s20   ;;  %s827_s19 = sphi %s877_s19, %s1075_s19   ;;  %s823_s18 = sphi %s875_s18, %s1074_s18  }
   0x7   : > { %p42_p0 = scmp.ne.s32.totalorder %s827_s19, %s823_s18  ;;  %p1056_p1 = scmp.eq.s32.totalorder %s896_s22, 0 }
   0x8   : > { %p156_p3 = scmp.eq.s32.totalorder %s552_s23, 1  ;;  %p553_p5 = scmp.ge.s32.totalorder %s835_s21, 1 }
   0x9   : > { %p905_p4 = por %p1056_p1, %p42_p0  ;;  %p163_p7 = scmp.lt.s32.totalorder %s835_s21, 3 }
   0xa   : > { %p910_p6 = por %p156_p3, %p42_p0  ;;  %s837_s27 = smov [#allocation5]  }
   0xb   : > { %s1060_s24 = scalar_select %p905_p4, 1, 0 }
   0xc   : > { %s1061_s25 = scalar_select %p910_p6, 1, 0 }
   0xd   : > { %p915_p8 = pnand %p553_p5, %p163_p7  ;;  %s175_s28 = sshll.u32 %s837_s27, 4  ;;  %s176_s28 = int_to_ptr.vmem [resolvable:$true] %s175_s28 }
   0xe   : > { %s838_s30 = smov [#allocation7]   ;;  %s698_s7 = scalar_lea.vmem %s176_s28, 512 }
   0xf   : > { %s1062_s26 = scalar_select %p915_p8, 1, 0 }
  0x10   : > { %p628_p9 = pneg %p915_p8  ;;  %s191_s6 = sshll.u32 %s838_s30, 4  ;;  %s192_s6 = int_to_ptr.vmem [resolvable:$true] %s191_s6 }
  0x11   : > { %p699_p13 = scmp.ne.s32.totalorder %s176_s28, %s698_s7  ;;  %p706_p5 = scmp.lt.s32.totalorder %s176_s28, %s176_s28 }
  0x12   : > { %p924_p11 = pnand %p628_p9, %p1056_p1  ;;  %p707_p7 = scmp.lt.s32.totalorder %s698_s7, %s698_s7 }
  0x14   : > { %p689_p12 = pneg %p924_p11  ;;  %p708_p10 = por %p707_p7, %p706_p5 }
  0x16   : > { %p701_p0 = pnand %p699_p13, %p689_p12 }
  0x18   : > { %p702_p3 = pneg %p701_p0 }
  0x1a   : > { %p709_p9 = pnand %p708_p10, %p702_p3 }
  0x1c   : > { %712 = shalt.err (!%p709_p9)
}
  0x1d   : > { %s839_s8 = smov 128   ;;  %s840_s9 = smov 8  }
  0x1e   : > { %631 = dma.hbm_to_vmem [thread:$0]  (!%p924_p11), %s1051_s1, 512, %s176_s28, [#allocation6], %s839_s8, %s839_s8, %s840_s9  }
  0x1f   : > { %s724_s12 = scalar_lea.vmem %s192_s6, 1024  ;;  %p732_p2 = scmp.lt.s32.totalorder %s192_s6, %s192_s6 }
  0x20   : > { %p725_p1 = scmp.ne.s32.totalorder %s192_s6, %s724_s12  ;;  %p733_p6 = scmp.lt.s32.totalorder %s724_s12, %s724_s12 }
  0x22   : > { %p727_p13 = pnand %p725_p1, %p689_p12  ;;  %p734_p5 = por %p733_p6, %p732_p2 }
  0x24   : > { %p728_p0 = pneg %p727_p13 }
  0x26   : > { %p735_p10 = pnand %p734_p5, %p728_p0 }
  0x28   : > { %738 = shalt.err (!%p735_p10)
}
  0x29   : > { %634 = dma.hbm_to_vmem [thread:$0]  (!%p924_p11), %s1053_s3, 1024, %s192_s6, [#allocation6], %s839_s8, %s839_s8, %s840_s9  }
  0x2a   : > { %s947_s15 = sadd.s32 1, %s835_s21   ;;  %s29_s16 = sadd.s32 1, %s831_s20 }
  0x2b   : > { %s26_s17 = ssub.s32 %s835_s21, %s947_s15  ;;  %p36_p1 = scmp.ne.s32.totalorder %s831_s20, %s827_s19 }
  0x2c   : > { %p27_p2 = scmp.eq.s32.totalorder %s26_s17, 0  ;;  %p37_p6 = scmp.eq.s32.totalorder %s835_s21, 0 }
  0x2d   : > { %p1064_p12 = scmp.eq.s32.totalorder %s896_s22, 1  ;;  %p645_p7 = scmp.lt.s32.totalorder %s835_s21, 2 }
  0x2e   : > { %s963_s27 = scalar_select %p27_p2, %s831_s20, %s29_s16  }
  0x2f   : > { %p957_p3 = por %p1064_p12, %p36_p1  ;;  %p38_p9 = por %p37_p6, %p36_p1 }
  0x30   : > { %s208_s28 = sand.u32 1, %s831_s20   ;;  %s558_s30 = sshll.u32 %s835_s21, 7 }
  0x31   : > { %s1065_s23 = scalar_select %p957_p3, 1, 0 }
  0x32   : > { %s557_s29 = sshll.u32 %s208_s28, 3  ;;  %s970_s8 = scalar_lea.hbm %s1050_s0, %s558_s30 }
  0x33   : > { %s212_s9 = scalar_lea.vmem [#allocation2], %s557_s29  ;;  %p972_p11 = pnand %p645_p7, %p38_p9 }
  0x34   : > { %s219_s10 = sshll.u32 %s212_s9, 4  ;;  %s209_s12 = scalar_lea.sflag [#allocation3], %s208_s28  ;;  %s220_s10 = int_to_ptr.vmem [resolvable:$true] %s219_s10 }
  0x35   : > { %s739_s13 = scalar_lea.hbm %s970_s8, 128  ;;  %p741_p0 = pneg %p972_p11 }
  0x36   : > { %p740_p13 = scmp.ne.s32.totalorder %s970_s8, %s739_s13  ;;  %s744_s17 = scalar_lea.hbm %s1050_s0, 256 }
  0x37   : > { %p745_p1 = scmp.lt.s32.totalorder %s970_s8, %s1050_s0  ;;  %p746_p2 = scmp.lt.s32.totalorder %s744_s17, %s739_s13 }
  0x38   : > { %p742_p5 = pnand %p741_p0, %p740_p13 }
  0x39   : > { %p747_p6 = por %p746_p2, %p745_p1 }
  0x3a   : > { %p743_p10 = pneg %p742_p5 }
  0x3c   : > { %p748_p12 = pnand %p747_p6, %p743_p10 }
  0x3e   : > { %751 = shalt.err (!%p748_p12)
}
  0x3f   : > { %s752_s6 = scalar_lea.vmem %s220_s10, 128  ;;  %s841_s28 = smov [#allocation2]  }
  0x40   : > { %p753_p7 = scmp.ne.s32.totalorder %s220_s10, %s752_s6  ;;  %s757_s7 = sshll.u32 %s841_s28, 4  ;;  %s758_s7 = int_to_ptr.vmem [resolvable:$false] %s757_s7 }
  0x41   : > { %s759_s9 = scalar_lea.vmem %s758_s7, 256  ;;  %p760_p13 = scmp.lt.s32.totalorder %s220_s10, %s758_s7 }
  0x42   : > { %p755_p9 = pnand %p753_p7, %p741_p0  ;;  %p761_p5 = scmp.lt.s32.totalorder %s759_s9, %s752_s6 }
  0x44   : > { %p756_p3 = pneg %p755_p9  ;;  %p762_p4 = por %p761_p5, %p760_p13 }
  0x46   : > { %p763_p8 = pnand %p762_p4, %p756_p3 }
  0x48   : > { %766 = shalt.err (!%p763_p8)
}
  0x49   : > { %638 = dma.hbm_to_vmem [thread:$0]  (!%p972_p11), %s970_s8, 128, %s220_s10, %s209_s12  }
  0x4a   : > { %p1067_p10 = scmp.ne.s32.totalorder %s1062_s26, 0 }
  0x4b   : > { %s993_s13 = sand.u32 (!%p1067_p10), 1, %s827_s19   ;;  %p1068_p4 = scmp.ne.s32.totalorder (!%p1067_p10), %s1060_s24, 0 }
  0x4c   : > { %228 = sbr.rel (%p1067_p10) target bundleno = 506 (0x1fa), region = 40  ;;  %s560_s14 = sshll.u32 (!%p1067_p10), %s993_s13, 3 }
  0x4d   : > { %s231_s16 = scalar_lea.sflag (!%p1067_p10), [#allocation3], %s993_s13  ;;  %s234_s17 = scalar_lea.vmem (!%p1067_p10), [#allocation2], %s560_s14 }
  0x51   : > { %810 = dma.done.wait (%p1068_p4), %s231_s16, 128  }
  0x52   : > { %812 = vsyncadd (%p1068_p4), %s231_s16, 4294967168  ;;  %p1069_p8 = scmp.eq.s32.totalorder %s896_s22, 0 }
  0x54   : > { %814 = dma.done.wait (%p1069_p8), [#allocation6], 1536   ;;  %p1070_p3 = pmov %p1069_p8 }
  0x55   : > { %v842_v0 = vmov 0.0   ;;  %vm843_vm0 = vmmov 0   ;;  %v272_v1 = vld [vmem:[#allocation5 + $0x18] sm:$0xff]  ;;  %v271_v2 = vld [vmem:[#allocation5 + $0x10] sm:$0xff]  ;;  %v270_v4 = vld [vmem:[#allocation5 + $0x8] sm:$0xff]  ;;  %vm290_vm1 = vcmask 261120  }
  0x56   : > { %816 = vsyncadd (%p1070_p3), [#allocation6], 4294965760  ;;  %586 = vmatprep.subr.mxu0 %v842_v0  ;;  %594 = vmatprep.mubr.msk.f32.mxu0 %vm843_vm0, %v842_v0  ;;  %v280_v3 = vld [vmem:[#allocation7 + $0x38] sm:$0xff]  ;;  %v279_v5 = vld [vmem:[#allocation7 + $0x30] sm:$0xff]  ;;  %vm372_vm2 = vcmask 523264   ;;  %s569_s11 = sshll.u32 %s896_s22, 7 }
  0x57   : > { %597 = vmatprep.subr.mxu1 %v842_v0  ;;  %613 = vmatprep.mubr.msk.f32.mxu1 %vm843_vm0, %v842_v0  ;;  %v278_v6 = vld [vmem:[#allocation7 + $0x28] sm:$0xff]  ;;  %v269_v7 = vld [vmem:[#allocation5] sm:$0xff]  ;;  %v283_v8 = vld [vmem:[%s234_s17] sm:$0xff]  ;;  %s268_s12 = scalar_lea.vmem [#allocation8], %s560_s14  ;;  %s461_s28 = scalar_lea.hbm %s1055_s5, %s569_s11 }
  0x58   : > { %587 = vmatpush3.msra.mxu0 %v272_v1  ;;  %598 = vmatpush3.msra.mxu1 %v280_v3  ;;  %v277_v9 = vld [vmem:[#allocation7 + $0x20] sm:$0xff]  ;;  %v276_v10 = vld [vmem:[#allocation7 + $0x18] sm:$0xff]  ;;  %v275_v11 = vld [vmem:[#allocation7 + $0x10] sm:$0xff]  ;;  %s463_s30 = sshll.u32 %s268_s12, 4  ;;  %s450_s7 = scalar_lea.sflag [#allocation4], %s993_s13  ;;  %s464_s30 = int_to_ptr.vmem [resolvable:$true] %s463_s30 }
  0x59   : > { %588 = vmatprep.subr.mxu0 %v842_v0  ;;  %599 = vmatprep.subr.mxu1 %v842_v0  ;;  %v274_v12 = vld [vmem:[#allocation7 + $0x8] sm:$0xff]  ;;  %v273_v13 = vld [vmem:[#allocation7] sm:$0xff]  ;;  %v564_v14 = vld [vmem:[%s1052_s2] ss:$0 sm:$0xff]  ;;  %s767_s9 = scalar_lea.vmem %s464_s30, 128  ;;  %p1071_p0 = scmp.ne.s32.totalorder %s1065_s23, 0 }
  0x5a   : > { %589 = vmatpush3.msra.mxu0 %v271_v2  ;;  %600 = vmatpush3.msra.mxu1 %v279_v5  ;;  %v566_v20 = vld [vmem:[%s1054_s4] ss:$0 sm:$0xff]  ;;  %p768_p11 = scmp.ne.s32.totalorder %s464_s30, %s767_s9  ;;  %s844_s16 = smov [#allocation8]  }
  0x5b   : > { %590 = vmatprep.subr.mxu0 %v842_v0  ;;  %601 = vmatprep.subr.mxu1 %v842_v0  ;;  %s771_s17 = sshll.u32 %s844_s16, 4  ;;  %s772_s17 = int_to_ptr.vmem [resolvable:$false] %s771_s17 }
  0x5c   : > { %591 = vmatpush3.msra.mxu0 %v270_v4  ;;  %602 = vmatpush3.msra.mxu1 %v278_v6  ;;  %p769_p1 = pnand %p768_p11, %p1071_p0  ;;  %s773_s22 = scalar_lea.vmem %s772_s17, 256 }
  0x5d   : > { %592 = vmatprep.subr.mxu0 %v842_v0  ;;  %603 = vmatprep.subr.mxu1 %v842_v0  ;;  %p774_p6 = scmp.lt.s32.totalorder %s464_s30, %s772_s17  ;;  %p775_p12 = scmp.lt.s32.totalorder %s773_s22, %s767_s9 }
  0x5e   : > { %593 = vmatpush3.msra.mxu0 %v269_v7  ;;  %604 = vmatpush3.msra.mxu1 %v277_v9  ;;  %p770_p2 = pneg %p769_p1 }
  0x5f   : > { %595 = vmatmul.mubr.msk.f32.vlgmr.msra.gmra.mxu0 %vm290_vm1, %v283_v8  ;;  %605 = vmatprep.subr.mxu1 %v842_v0  ;;  %p776_p7 = por %p775_p12, %p774_p6 }
  0x60   : > { %606 = vmatpush3.msra.mxu1 %v276_v10 }
  0x61   : > { %607 = vmatprep.subr.mxu1 %v842_v0  ;;  %p777_p9 = pnand %p776_p7, %p770_p2 }
  0x62   : > { %608 = vmatpush3.msra.mxu1 %v275_v11 }
  0x63   : > { %609 = vmatprep.subr.mxu1 %v842_v0 }
  0x64   : > { %610 = vmatpush3.msra.mxu1 %v274_v12 }
  0x65   : > { %611 = vmatprep.subr.mxu1 %v842_v0 }
  0x66   : > { %612 = vmatpush3.msra.mxu1 %v273_v13 }
 0x11f   : > { %v360_v15 = vpop.f32.mrf.mxu0 }
 0x120   : > { %v361_v16 = vadd.f32 %v564_v14, %v360_v15 }
 0x121   : > { %v596_v17 = vpop.f32.mrf.mxu0 }
 0x122   : > { %v364_v18 = vmul.f32 0.01, %v361_v16 }
 0x124   : > { %v365_v19 = vmax.f32 %v361_v16, %v364_v18 }
 0x126   : > { %614 = vmatmul.mubr.msk.f32.vlgmr.msra.gmra.mxu1 %vm372_vm2, %v365_v19 }
 0x1e6   : > { %v442_v21 = vpop.f32.mrf.mxu1 }
 0x1e7   : > { %v443_v22 = vadd.f32 %v566_v20, %v442_v21 }
 0x1e8   : > { %v615_v23 = vpop.f32.mrf.mxu1 }
 0x1e9   : > { %v446_v24 = vmul.f32 0.01, %v443_v22 }
 0x1eb   : > { %v447_v25 = vmax.f32 %v443_v22, %v446_v24 }
 0x1ed   : > { %448 = vst [vmem:[%s268_s12] sm:$0xff] %v447_v25 }
 0x1ee   : > { %780 = shalt.err (!%p777_p9)
}
 0x1ef   : > { %s781_s14 = scalar_lea.hbm %s461_s28, 128  ;;  %s785_s26 = scalar_lea.hbm %s1055_s5, 256 }
 0x1f0   : > { %p782_p13 = scmp.ne.s32.totalorder %s461_s28, %s781_s14  ;;  %p786_p4 = scmp.lt.s32.totalorder %s461_s28, %s1055_s5 }
 0x1f1   : > { %p787_p8 = scmp.lt.s32.totalorder %s785_s26, %s781_s14 }
 0x1f2   : > { %p783_p5 = pnand %p782_p13, %p1071_p0 }
 0x1f3   : > { %p788_p3 = por %p787_p8, %p786_p4 }
 0x1f4   : > { %p784_p10 = pneg %p783_p5 }
 0x1f6   : > { %p789_p11 = pnand %p788_p3, %p784_p10 }
 0x1f8   : > { %792 = shalt.err (!%p789_p11)
}
 0x1f9   : > { %626 = dma.vmem_to_hbm [thread:$0]  (%p1071_p0), %s464_s30, 128, %s461_s28, %s450_s7  }
 0x1fa PF: > { %s475_s11 = sand.u32 1, %s823_s18   ;;  %p1072_p1 = scmp.ne.s32.totalorder %s1061_s25, 0 }
 0x1fb   : > { %p1073_p2 = scmp.ge.s32.totalorder %s835_s21, 2  ;;  %s476_s12 = scalar_lea.sflag [#allocation4], %s475_s11 }
 0x1fd   : > { %p640_p6 = pnand %p1073_p2, %p1072_p1 }
 0x1ff   : > { %p641_p12 = pneg %p640_p6 }
 0x201   : > { %818 = dma.done.wait (%p641_p12), %s476_s12, 128  }
 0x202   : > { %820 = vsyncadd (%p641_p12), %s476_s12, 4294967168  ;;  %p19_p7 = scmp.ge.s32.totalorder %s947_s15, 4   ;;  %s1074_s18 = smov %s827_s19 }
 0x203   : > { %s1075_s19 = smov %s831_s20  ;;  %s1076_s20 = smov %s963_s27 }
 0x204   : > { %s1077_s21 = smov %s947_s15  ;;  %21 = sbr.rel (!%p19_p7) target bundleno = 6 (0x6), region = 93 }
 0x209   :  { %481 = vsyncpa [#allocation3], 1 }
 0x20a   :  { %483 = vsyncpa [#allocation3 + $0x1], 1 }
 0x20b   :  { %484 = vsyncpa [#allocation6], 1 }
 0x20c   :  { %485 = vsyncpa [#allocation4], 1 }
 0x20d   :  { %487 = vsyncpa [#allocation4 + $0x1], 1 }

</bundles_post_ra>
